<compile_context>
chip_gen: v7x
topology: tpu7x:2x2x1
jax: 0.10.0
libtpu: 0.0.40
codegen_flags: <defaults>
</compile_context>

<pallas_src>
import jax
import jax.numpy as jnp
from jax.experimental import pallas as pl
from jax.experimental.pallas import tpu as pltpu


def _round_up(x: int, m: int) -> int:
    return ((x + m - 1) // m) * m


# ---------------------------------------------------------------------------
# Kernel: one batch tile of the whole forward pass.
#   e = relu(x @ We + be); c = relu(e @ Wc + bc); out = c @ Wh + bh
# Wh/bh are the action + value heads fused into one lane-dense (., 128) slab;
# the split back into (actions, value) happens in the wrapper (layout plumbing).
# ---------------------------------------------------------------------------
def _policy_kernel(x_ref, we_ref, be_ref, wc_ref, bc_ref, wh_ref, bh_ref, out_ref):
    w_dtype = we_ref.dtype  # f32 or bf16; accumulation is always f32

    # Layer 1: embeddings + ReLU.
    e = jnp.dot(x_ref[...], we_ref[...], preferred_element_type=jnp.float32)
    e = jnp.maximum(e + be_ref[...], 0.0)

    # Layer 2: common Linear + ReLU.
    c = jnp.dot(e.astype(w_dtype), wc_ref[...], preferred_element_type=jnp.float32)
    c = jnp.maximum(c + bc_ref[...], 0.0)

    # Layer 3: fused action + value heads (no final ReLU).
    h = jnp.dot(c.astype(w_dtype), wh_ref[...], preferred_element_type=jnp.float32)
    out_ref[...] = (h + bh_ref[...]).astype(out_ref.dtype)


# ---------------------------------------------------------------------------
# One-time parameter packing (call once, reuse for every forward step).
# ---------------------------------------------------------------------------
def prepare_params(params, *, compute_dtype=jnp.float32):
    """Pack BasicPolicy params for the kernel. Weights stored (in, out).

    Zero-pads the embedding width to a multiple of 128 (lane-dense intermediate)
    and fuses the action + value heads into one 128-wide slab. Zero padding
    preserves the math exactly. Biases stay f32; weights use `compute_dtype`.
    """
    we, be = params["we"], params["be"]
    wc, bc = params["wc"], params["bc"]
    wa, ba = params["wa"], params["ba"]
    wv, bv = params["wv"], params["bv"]

    obs_size, emb = we.shape
    common = wc.shape[1]
    num_actions = wa.shape[1]
    n_head = num_actions + 1                       # actions + value packed together

    emb_pad = _round_up(max(emb, 128), 128)
    n_pad = _round_up(max(n_head, 128), 128)
    cdt = compute_dtype

    we_p = jnp.zeros((obs_size, emb_pad), cdt).at[:, :emb].set(we.astype(cdt))
    be_p = jnp.zeros((1, emb_pad), jnp.float32).at[:, :emb].set(be.astype(jnp.float32))
    wc_p = jnp.zeros((emb_pad, common), cdt).at[:emb, :].set(wc.astype(cdt))
    bc_p = bc.astype(jnp.float32).reshape(1, common)

    wh_p = jnp.zeros((common, n_pad), cdt)
    wh_p = wh_p.at[:, :num_actions].set(wa.astype(cdt))
    wh_p = wh_p.at[:, num_actions:n_head].set(wv.astype(cdt))
    bh_p = jnp.zeros((1, n_pad), jnp.float32)
    bh_p = bh_p.at[:, :num_actions].set(ba.astype(jnp.float32))
    bh_p = bh_p.at[:, num_actions:n_head].set(bv.astype(jnp.float32))

    return {
        "we": we_p, "be": be_p, "wc": wc_p, "bc": bc_p, "wh": wh_p, "bh": bh_p,
        "num_actions": int(num_actions), "n_head": int(n_head),
    }


def _pick_block_rows(batch: int) -> int:
    """Rows per grid step (always a multiple of 8)."""
    if batch <= 256:
        return _round_up(batch, 8)                 # single step
    if batch <= 2048:
        return _round_up(pl.cdiv(batch, 2), 8)     # >=2 steps (v7x megacore)
    return 1024                                    # >=3 steps; ~6.5 MiB VMEM max


def _fallback_forward(x, packed):
    """Plain XLA path for tiny batches (kernel launch overhead dominates)."""
    cdt = packed["we"].dtype
    xc = x.astype(cdt)
    e = jnp.maximum(
        jnp.dot(xc, packed["we"], preferred_element_type=jnp.float32) + packed["be"], 0.0)
    c = jnp.maximum(
        jnp.dot(e.astype(cdt), packed["wc"], preferred_element_type=jnp.float32) + packed["bc"], 0.0)
    h = jnp.dot(c.astype(cdt), packed["wh"], preferred_element_type=jnp.float32) + packed["bh"]
    na, nh = packed["num_actions"], packed["n_head"]
    return h[:, :na], h[:, na:nh]


def basic_policy_forward(x, packed, *, small_batch_fallback_threshold=0):
    """x: (B, obs_size). packed: prepare_params() output.

    Returns (actions, value) with shapes (B, num_actions) and (B, 1).
    """
    num_actions = packed["num_actions"]
    n_head = packed["n_head"]
    we_p, be_p = packed["we"], packed["be"]
    wc_p, bc_p = packed["wc"], packed["bc"]
    wh_p, bh_p = packed["wh"], packed["bh"]

    obs_size, emb_pad = we_p.shape
    common, n_pad = wh_p.shape
    B = x.shape[0]
    assert x.shape[1] == obs_size

    if B < small_batch_fallback_threshold:
        return _fallback_forward(x, packed)

    compute_dtype = we_p.dtype
    x_c = x.astype(compute_dtype)

    tb = _pick_block_rows(B)
    grid = (pl.cdiv(B, tb),)                       # ragged last block handled by Pallas

    # Batch-streamed x / out; weights + biases are full resident blocks.
    x_spec = pl.BlockSpec((tb, obs_size), lambda i: (i, 0))
    out_spec = pl.BlockSpec((tb, n_pad), lambda i: (i, 0))
    resident = lambda a: pl.BlockSpec(a.shape, lambda i: (0, 0))

    itemsize = jnp.dtype(compute_dtype).itemsize
    flops = 2 * B * (obs_size * emb_pad + emb_pad * common + common * n_pad)
    bytes_accessed = (
        itemsize * (x_c.size + we_p.size + wc_p.size + wh_p.size)
        + 4 * (be_p.size + bc_p.size + bh_p.size)
        + 4 * B * n_pad)
    cost = pl.CostEstimate(flops=flops, transcendentals=0,
                           bytes_accessed=bytes_accessed)

    out = pl.pallas_call(
        _policy_kernel,
        out_shape=jax.ShapeDtypeStruct((B, n_pad), jnp.float32),
        grid=grid,
        in_specs=[x_spec,
                  resident(we_p), resident(be_p),
                  resident(wc_p), resident(bc_p),
                  resident(wh_p), resident(bh_p)],
        out_specs=out_spec,
        compiler_params=pltpu.CompilerParams(
            dimension_semantics=("parallel",)),
        cost_estimate=cost,
    )(x_c, we_p, be_p, wc_p, bc_p, wh_p, bh_p)

    actions = out[:, :num_actions]
    value = out[:, num_actions:n_head]
    return actions, value


# ---------------------------------------------------------------------------
# Test harness
# ---------------------------------------------------------------------------
def init_params(key, obs_size, embedding_size, common_size, num_actions):
    """Deterministic synthetic parameters (weights stored as (in, out))."""
    ks = jax.random.split(key, 8)
    s = lambda n: 1.0 / jnp.sqrt(jnp.float32(n))
    return {
        "we": jax.random.uniform(ks[0], (obs_size, embedding_size), jnp.float32,
                                 -s(obs_size), s(obs_size)),
        "be": jax.random.uniform(ks[1], (1, embedding_size), jnp.float32,
                                 -s(obs_size), s(obs_size)),
        "wc": jax.random.uniform(ks[2], (embedding_size, common_size), jnp.float32,
                                 -s(embedding_size), s(embedding_size)),
        "bc": jax.random.uniform(ks[3], (1, common_size), jnp.float32,
                                 -s(embedding_size), s(embedding_size)),
        "wa": jax.random.uniform(ks[4], (common_size, num_actions), jnp.float32,
                                 -s(common_size), s(common_size)),
        "ba": jax.random.uniform(ks[5], (1, num_actions), jnp.float32,
                                 -s(common_size), s(common_size)),
        "wv": jax.random.uniform(ks[6], (common_size, 1), jnp.float32,
                                 -s(common_size), s(common_size)),
        "bv": jax.random.uniform(ks[7], (1, 1), jnp.float32,
                                 -s(common_size), s(common_size)),
    }


def reference_forward(x, p):
    hp = jax.lax.Precision.HIGHEST
    e = jnp.maximum(jnp.dot(x, p["we"], precision=hp) + p["be"], 0.0)
    c = jnp.maximum(jnp.dot(e, p["wc"], precision=hp) + p["bc"], 0.0)
    return (jnp.dot(c, p["wa"], precision=hp) + p["ba"],
            jnp.dot(c, p["wv"], precision=hp) + p["bv"])


if __name__ == "__main__":
    # Shapes consistent with the module: obs_shape=[4, 16] -> obs_size=64,
    # embedding_size=32, common_layers=(256,), num_actions=8.
    obs_shape = (4, 16)
    obs_size = obs_shape[0] * obs_shape[1]
    embedding_size = 32
    common_size = 256
    num_actions = 8

    key = jax.random.PRNGKey(0)
    k_x, k_p, k_x2 = jax.random.split(key, 3)
    params = init_params(k_p, obs_size, embedding_size, common_size, num_actions)
    packed = prepare_params(params)                 # one-time packing (f32)

    # 1) Small inference-style batch (single grid step).
    B = 8
    x = jax.random.normal(k_x, (B,) + obs_shape, jnp.float32).reshape(B, obs_size)
    actions, value = basic_policy_forward(x, packed)
    jax.block_until_ready((actions, value))
    ref_a, ref_v = reference_forward(x, params)
    assert actions.shape == (B, num_actions) and value.shape == (B, 1)
    assert jnp.allclose(actions, ref_a, atol=1e-3, rtol=1e-3)
    assert jnp.allclose(value, ref_v, atol=1e-3, rtol=1e-3)

    # 2) Larger ragged batch: exercises the multi-step grid and the masked
    #    writeback of the partial last block (no host-side x padding anymore).
    B2 = 300
    x2 = jax.random.normal(k_x2, (B2, obs_size), jnp.float32)
    a2, v2 = basic_policy_forward(x2, packed)
    jax.block_until_ready((a2, v2))
    r2a, r2v = reference_forward(x2, params)
    assert a2.shape == (B2, num_actions) and v2.shape == (B2, 1)
    assert jnp.allclose(a2, r2a, atol=1e-3, rtol=1e-3)
    assert jnp.allclose(v2, r2v, atol=1e-3, rtol=1e-3)

    print("KERNEL_OK")
</pallas_src>

<mosaic_0001>
module attributes {stable_mosaic.version = 11 : i64} {
  func.func @_policy_kernel(%arg0: i32, %arg1: memref<8x64xf32, #tpu.memory_space<vmem>>, %arg2: memref<64x128xf32, #tpu.memory_space<vmem>>, %arg3: memref<1x128xf32, #tpu.memory_space<vmem>>, %arg4: memref<128x256xf32, #tpu.memory_space<vmem>>, %arg5: memref<1x256xf32, #tpu.memory_space<vmem>>, %arg6: memref<256x128xf32, #tpu.memory_space<vmem>>, %arg7: memref<1x128xf32, #tpu.memory_space<vmem>>, %arg8: memref<8x128xf32, #tpu.memory_space<vmem>>) attributes {dimension_semantics = [#tpu.dimension_semantics<parallel>], iteration_bounds = array<i64: 1>, scalar_prefetch = 0 : i64, scratch_operands = 0 : i64, tpu.core_type = #tpu.core_type<tc>, window_params = [{transform_indices = @transform_0, window_bounds = array<i64: 8, 64>}, {pipeline_mode = #tpu.pipeline_mode<synchronous>, transform_indices = @transform_1, window_bounds = array<i64: 64, 128>}, {pipeline_mode = #tpu.pipeline_mode<synchronous>, transform_indices = @transform_2, window_bounds = array<i64: 1, 128>}, {pipeline_mode = #tpu.pipeline_mode<synchronous>, transform_indices = @transform_3, window_bounds = array<i64: 128, 256>}, {pipeline_mode = #tpu.pipeline_mode<synchronous>, transform_indices = @transform_4, window_bounds = array<i64: 1, 256>}, {pipeline_mode = #tpu.pipeline_mode<synchronous>, transform_indices = @transform_5, window_bounds = array<i64: 256, 128>}, {pipeline_mode = #tpu.pipeline_mode<synchronous>, transform_indices = @transform_6, window_bounds = array<i64: 1, 128>}, {transform_indices = @transform_7, window_bounds = array<i64: 8, 128>}]} {
    %c0 = arith.constant 0 : index
    %c0_0 = arith.constant 0 : index
    %0 = vector.load %arg1[%c0, %c0_0] : memref<8x64xf32, #tpu.memory_space<vmem>>, vector<8x64xf32>
    %c0_1 = arith.constant 0 : index
    %c0_2 = arith.constant 0 : index
    %1 = vector.load %arg2[%c0_1, %c0_2] : memref<64x128xf32, #tpu.memory_space<vmem>>, vector<64x128xf32>
    %cst = arith.constant dense<0.000000e+00> : vector<8x128xf32>
    %2 = tpu.matmul %0, %1, %cst {dimension_numbers = #tpu.dot_dimension_numbers<[1], [0], [0], [1], [0, 0, 1, 1], [], []>} : vector<8x64xf32>, vector<64x128xf32>, vector<8x128xf32> -> vector<8x128xf32>
    %c0_3 = arith.constant 0 : index
    %c0_4 = arith.constant 0 : index
    %3 = vector.load %arg3[%c0_3, %c0_4] : memref<1x128xf32, #tpu.memory_space<vmem>>, vector<1x128xf32>
    %4 = vector.broadcast %3 : vector<1x128xf32> to vector<8x128xf32>
    %5 = arith.addf %2, %4 : vector<8x128xf32>
    %cst_5 = arith.constant 0.000000e+00 : f32
    %6 = vector.broadcast %cst_5 : f32 to vector<8x128xf32>
    %7 = arith.maximumf %5, %6 : vector<8x128xf32>
    %c0_6 = arith.constant 0 : index
    %c0_7 = arith.constant 0 : index
    %8 = vector.load %arg4[%c0_6, %c0_7] : memref<128x256xf32, #tpu.memory_space<vmem>>, vector<128x256xf32>
    %cst_8 = arith.constant dense<0.000000e+00> : vector<8x256xf32>
    %9 = tpu.matmul %7, %8, %cst_8 {dimension_numbers = #tpu.dot_dimension_numbers<[1], [0], [0], [1], [0, 0, 1, 1], [], []>} : vector<8x128xf32>, vector<128x256xf32>, vector<8x256xf32> -> vector<8x256xf32>
    %c0_9 = arith.constant 0 : index
    %c0_10 = arith.constant 0 : index
    %10 = vector.load %arg5[%c0_9, %c0_10] : memref<1x256xf32, #tpu.memory_space<vmem>>, vector<1x256xf32>
    %11 = vector.broadcast %10 : vector<1x256xf32> to vector<8x256xf32>
    %12 = arith.addf %9, %11 : vector<8x256xf32>
    %cst_11 = arith.constant 0.000000e+00 : f32
    %13 = vector.broadcast %cst_11 : f32 to vector<8x256xf32>
    %14 = arith.maximumf %12, %13 : vector<8x256xf32>
    %c0_12 = arith.constant 0 : index
    %c0_13 = arith.constant 0 : index
    %15 = vector.load %arg6[%c0_12, %c0_13] : memref<256x128xf32, #tpu.memory_space<vmem>>, vector<256x128xf32>
    %cst_14 = arith.constant dense<0.000000e+00> : vector<8x128xf32>
    %16 = tpu.matmul %14, %15, %cst_14 {dimension_numbers = #tpu.dot_dimension_numbers<[1], [0], [0], [1], [0, 0, 1, 1], [], []>} : vector<8x256xf32>, vector<256x128xf32>, vector<8x128xf32> -> vector<8x128xf32>
    %c0_15 = arith.constant 0 : index
    %c0_16 = arith.constant 0 : index
    %17 = vector.load %arg7[%c0_15, %c0_16] : memref<1x128xf32, #tpu.memory_space<vmem>>, vector<1x128xf32>
    %18 = vector.broadcast %17 : vector<1x128xf32> to vector<8x128xf32>
    %19 = arith.addf %16, %18 : vector<8x128xf32>
    %c0_17 = arith.constant 0 : index
    %c0_18 = arith.constant 0 : index
    %20 = vector.load %arg8[%c0_17, %c0_18] : memref<8x128xf32, #tpu.memory_space<vmem>>, vector<8x128xf32>
    tpu.vector_store %arg8[%c0_17, %c0_18], %19 {strides = array<i32>} : memref<8x128xf32, #tpu.memory_space<vmem>>, vector<8x128xf32>,
    return
  }
  func.func @transform_0(%arg0: i32) -> (i32, i32) {
    %c0_i32 = arith.constant 0 : i32
    %c0_i32_0 = arith.constant 0 : i32
    return %arg0, %c0_i32 : i32, i32
  }
  func.func @transform_1(%arg0: i32) -> (i32, i32) {
    %c0_i32 = arith.constant 0 : i32
    %c0_i32_0 = arith.constant 0 : i32
    %c0_i32_1 = arith.constant 0 : i32
    return %c0_i32, %c0_i32_0 : i32, i32
  }
  func.func @transform_2(%arg0: i32) -> (i32, i32) {
    %c0_i32 = arith.constant 0 : i32
    %c0_i32_0 = arith.constant 0 : i32
    %c0_i32_1 = arith.constant 0 : i32
    return %c0_i32, %c0_i32_0 : i32, i32
  }
  func.func @transform_3(%arg0: i32) -> (i32, i32) {
    %c0_i32 = arith.constant 0 : i32
    %c0_i32_0 = arith.constant 0 : i32
    %c0_i32_1 = arith.constant 0 : i32
    return %c0_i32, %c0_i32_0 : i32, i32
  }
  func.func @transform_4(%arg0: i32) -> (i32, i32) {
    %c0_i32 = arith.constant 0 : i32
    %c0_i32_0 = arith.constant 0 : i32
    %c0_i32_1 = arith.constant 0 : i32
    return %c0_i32, %c0_i32_0 : i32, i32
  }
  func.func @transform_5(%arg0: i32) -> (i32, i32) {
    %c0_i32 = arith.constant 0 : i32
    %c0_i32_0 = arith.constant 0 : i32
    %c0_i32_1 = arith.constant 0 : i32
    return %c0_i32, %c0_i32_0 : i32, i32
  }
  func.func @transform_6(%arg0: i32) -> (i32, i32) {
    %c0_i32 = arith.constant 0 : i32
    %c0_i32_0 = arith.constant 0 : i32
    %c0_i32_1 = arith.constant 0 : i32
    return %c0_i32, %c0_i32_0 : i32, i32
  }
  func.func @transform_7(%arg0: i32) -> (i32, i32) {
    %c0_i32 = arith.constant 0 : i32
    %c0_i32_0 = arith.constant 0 : i32
    return %arg0, %c0_i32 : i32, i32
  }
}

</mosaic_0001>

<bundles_post_ra>
// kernel: tpu_custom_call.1
= control target key start
LH: loop header
LB: loop body
LE: loop exit
PB: predicated region body
PF: predicated region fallthrough
CT: control target
= control target key end

     0   :  { %12 = vsyncpa [#allocation3], 0  ;;  %s814_s0 = inlined_call_operand.hbm [shape: f32[8,64], index: 0, kind: input, shape index: {}]   ;;  %s815_s1 = inlined_call_operand.hbm [shape: f32[64,128], index: 1, kind: input, shape index: {}]   ;;  %s816_s2 = inlined_call_operand.vmem [shape: f32[1,128], index: 2, kind: input, shape index: {}]   ;;  %s817_s3 = inlined_call_operand.hbm [shape: f32[128,256], index: 3, kind: input, shape index: {}]   ;;  %s818_s4 = inlined_call_operand.vmem [shape: f32[1,256], index: 4, kind: input, shape index: {}]   ;;  %s819_s5 = inlined_call_operand.hbm [shape: f32[256,128], index: 5, kind: input, shape index: {}]   ;;  %s820_s6 = inlined_call_operand.vmem [shape: f32[1,128], index: 6, kind: input, shape index: {}]   ;;  %s821_s7 = inlined_call_operand.hbm [shape: f32[8,128], index: 7, kind: output, shape index: {}]  }
   0x1   :  { %13 = vsyncpa [#allocation6], 0 }
   0x2   :  { %14 = vsyncpa [#allocation9], 0 }
   0x3   :  { %15 = vsyncpa [#allocation4], 0  ;;  %s687_s24 = smov [#allocation5]   ;;  %s569_s28 = scalar_lea.hbm %s815_s1, 1024 }
   0x4   :  { %s31_s25 = sshll.u32 %s687_s24, 4  ;;  %p570_p0 = scmp.ne.s32.totalorder %s815_s1, %s569_s28  ;;  %s32_s25 = int_to_ptr.vmem [resolvable:$true] %s31_s25 }
   0x5   :  { %p573_p1 = scmp.lt.u32.totalorder %s569_s28, %s815_s1 }
   0x7   :  { %p575_p2 = pnand %p573_p1, %p570_p0 }
   0x9   :  { %578 = shalt.err (!%p575_p2)
}
   0xa   :  { %s579_s10 = scalar_lea.vmem %s32_s25, 1024  ;;  %p584_p4 = scmp.lt.s32.totalorder %s32_s25, %s32_s25 }
   0xb   :  { %p580_p3 = scmp.ne.s32.totalorder %s32_s25, %s579_s10  ;;  %p585_p5 = scmp.lt.s32.totalorder %s579_s10, %s579_s10 }
   0xd   :  { %p586_p6 = por %p585_p5, %p584_p4 }
   0xf   :  { %p587_p7 = pnand %p586_p6, %p580_p3 }
  0x11   :  { %590 = shalt.err (!%p587_p7)
}
  0x12   :  { %s688_s11 = smov 128   ;;  %s689_s12 = smov 8  }
  0x13   :  { %37 = dma.hbm_to_vmem [thread:$0]  %s815_s1, 1024, %s32_s25, [#allocation6], %s688_s11, %s688_s11, %s689_s12  }
  0x14   :  { %s690_s15 = smov [#allocation2]   ;;  %s691_s17 = smov [#allocation7]  }
  0x15   :  { %s22_s16 = sshll.u32 %s690_s15, 4  ;;  %s45_s18 = sshll.u32 %s691_s17, 4  ;;  %s23_s16 = int_to_ptr.vmem [resolvable:$true] %s22_s16  ;;  %s46_s18 = int_to_ptr.vmem [resolvable:$true] %s45_s18 }
  0x16   :  { %s591_s21 = scalar_lea.hbm %s814_s0, 128 }
  0x17   :  { %p592_p8 = scmp.ne.s32.totalorder %s814_s0, %s591_s21  ;;  %p595_p9 = scmp.lt.u32.totalorder %s591_s21, %s814_s0 }
  0x19   :  { %p597_p10 = pnand %p595_p9, %p592_p8 }
  0x1b   :  { %600 = shalt.err (!%p597_p10)
}
  0x1c   :  { %s601_s1 = scalar_lea.vmem %s23_s16, 128  ;;  %p606_p12 = scmp.lt.s32.totalorder %s23_s16, %s23_s16 }
  0x1d   :  { %p602_p11 = scmp.ne.s32.totalorder %s23_s16, %s601_s1  ;;  %p607_p13 = scmp.lt.s32.totalorder %s601_s1, %s601_s1 }
  0x1f   :  { %p608_p0 = por %p607_p13, %p606_p12 }
  0x21   :  { %p609_p1 = pnand %p608_p0, %p602_p11 }
  0x23   :  { %612 = shalt.err (!%p609_p1)
}
  0x24   :  { %25 = dma.hbm_to_vmem [thread:$0]  %s814_s0, 128, %s23_s16, [#allocation3]  }
  0x25   :  { %s613_s30 = scalar_lea.hbm %s817_s3, 4096 }
  0x26   :  { %p614_p2 = scmp.ne.s32.totalorder %s817_s3, %s613_s30  ;;  %p617_p3 = scmp.lt.u32.totalorder %s613_s30, %s817_s3 }
  0x28   :  { %p619_p4 = pnand %p617_p3, %p614_p2 }
  0x2a   :  { %622 = shalt.err (!%p619_p4)
}
  0x2b   :  { %s623_s14 = scalar_lea.vmem %s46_s18, 4096  ;;  %p628_p6 = scmp.lt.s32.totalorder %s46_s18, %s46_s18 }
  0x2c   :  { %p624_p5 = scmp.ne.s32.totalorder %s46_s18, %s623_s14  ;;  %p629_p7 = scmp.lt.s32.totalorder %s623_s14, %s623_s14 }
  0x2e   :  { %p630_p8 = por %p629_p7, %p628_p6 }
  0x30   :  { %p631_p9 = pnand %p630_p8, %p624_p5 }
  0x32   :  { %634 = shalt.err (!%p631_p9)
}
  0x33   :  { %s692_s0 = smov 256   ;;  %s693_s15 = smov 16  }
  0x34   :  { %51 = dma.hbm_to_vmem [thread:$0]  %s817_s3, 4096, %s46_s18, [#allocation6], %s692_s0, %s692_s0, %s693_s15  }
  0x35   :  { %s694_s19 = smov [#allocation8]   ;;  %s635_s23 = scalar_lea.hbm %s819_s5, 4096 }
  0x36   :  { %s59_s20 = sshll.u32 %s694_s19, 4  ;;  %p636_p10 = scmp.ne.s32.totalorder %s819_s5, %s635_s23  ;;  %s60_s20 = int_to_ptr.vmem [resolvable:$true] %s59_s20 }
  0x37   :  { %p639_p11 = scmp.lt.u32.totalorder %s635_s23, %s819_s5 }
  0x39   :  { %p641_p12 = pnand %p639_p11, %p636_p10 }
  0x3b   :  { %644 = shalt.err (!%p641_p12)
}
  0x3c   :  { %s645_s27 = scalar_lea.vmem %s60_s20, 4096  ;;  %p650_p0 = scmp.lt.s32.totalorder %s60_s20, %s60_s20 }
  0x3d   :  { %p646_p13 = scmp.ne.s32.totalorder %s60_s20, %s645_s27  ;;  %p651_p1 = scmp.lt.s32.totalorder %s645_s27, %s645_s27 }
  0x3f   :  { %p652_p2 = por %p651_p1, %p650_p0 }
  0x41   :  { %p653_p3 = pnand %p652_p2, %p646_p13 }
  0x43   :  { %656 = shalt.err (!%p653_p3)
}
  0x44   :  { %65 = dma.hbm_to_vmem [thread:$0]  %s819_s5, 4096, %s60_s20, [#allocation9], %s688_s11, %s688_s11, %s689_s12  }
  0x45   :  { %679 = dma.done.wait [#allocation3], 128  }
  0x46   :  { %680 = vsyncadd [#allocation3], 4294967168 }
  0x47   :  { %681 = dma.done.wait [#allocation6], 5120  }
  0x48   :  { %682 = vsyncadd [#allocation6], 4294962176 }
  0x49   :  { %683 = dma.done.wait [#allocation9], 4096  }
  0x4a   :  { %684 = vsyncadd [#allocation9], 4294963200  ;;  %v695_v0 = vmov 0.0|0.0   ;;  %vm696_vm0 = vmmov 0   ;;  %v697_v1 = vmov 0.0   ;;  %v81_v2 = vld [vmem:[#allocation5] sm:$0xff] }
  0x4b   :  { %481 = vmatprep.subr.bf16.mxu0 %v695_v0  ;;  %478 = vmatprep.mubr.msk.f32.mxu0 %vm696_vm0, %v697_v1  ;;  %v82_v3 = vld [vmem:[#allocation5 + $0x8] sm:$0xff]  ;;  %v83_v4 = vld [vmem:[#allocation5 + $0x10] sm:$0xff]  ;;  %v84_v6 = vld [vmem:[#allocation5 + $0x18] sm:$0xff]  ;;  %vm96_vm1 = vcmask 523264   ;;  %s698_s30 = smov [#allocation10]  }
  0x4c   :  { %279 = vmatprep.mubr.f32.mxu1 %v697_v1  ;;  %v482_v5 = vpack.c.bf16 %v82_v3, %v81_v2  ;;  %v85_v7 = vld [vmem:[#allocation5 + $0x20] sm:$0xff]  ;;  %v86_v8 = vld [vmem:[#allocation5 + $0x28] sm:$0xff]  ;;  %v485_v9 = vpack.c.bf16 %v84_v6, %v83_v4  ;;  %v174_v11 = vld [vmem:[#allocation7 + $0x18] sm:$0xff]  ;;  %s404_s8 = sshll.u32 %s698_s30, 4  ;;  %s405_s8 = int_to_ptr.vmem [resolvable:$true] %s404_s8 }
  0x4d   :  { %v172_v10 = vld [vmem:[#allocation7 + $0x8] sm:$0xff]  ;;  %v171_v12 = vld [vmem:[#allocation7] sm:$0xff]  ;;  %v173_v14 = vld [vmem:[#allocation7 + $0x10] sm:$0xff]  ;;  %v488_v23 = vpack.c.bf16 %v86_v8, %v85_v7  ;;  %p662_p5 = scmp.lt.s32.totalorder %s405_s8, %s405_s8 }
  0x4e   :  { %483 = vmatpush3.bf16.msra.mxu0 %v482_v5  ;;  %v493_v13 = vpack.c.bf16 %v174_v11, %v172_v10  ;;  %v176_v15 = vld [vmem:[#allocation7 + $0x28] sm:$0xff]  ;;  %v178_v16 = vld [vmem:[#allocation7 + $0x38] sm:$0xff]  ;;  %v495_v17 = vpack.c.bf16 %v173_v14, %v171_v12  ;;  %v175_v19 = vld [vmem:[#allocation7 + $0x20] sm:$0xff] }
  0x4f   :  { %484 = vmatprep.subr.bf16.mxu0 %v695_v0  ;;  %v497_v18 = vpack.c.bf16 %v178_v16, %v176_v15  ;;  %v177_v20 = vld [vmem:[#allocation7 + $0x30] sm:$0xff]  ;;  %v180_v21 = vld [vmem:[#allocation7 + $0x48] sm:$0xff]  ;;  %v182_v22 = vld [vmem:[#allocation7 + $0x58] sm:$0xff] }
  0x50   :  { %494 = vmatprep.subr.bf16.mxu1 %v493_v13  ;;  %v87_v24 = vld [vmem:[#allocation5 + $0x30] sm:$0xff]  ;;  %v499_v25 = vpack.c.bf16 %v177_v20, %v175_v19  ;;  %v88_v26 = vld [vmem:[#allocation5 + $0x38] sm:$0xff]  ;;  %v501_v27 = vpack.c.bf16 %v182_v22, %v180_v21  ;;  %v179_v28 = vld [vmem:[#allocation7 + $0x40] sm:$0xff] }
  0x51   :  { %496 = vmatpush1.bf16.msra.mxu1 %v495_v17  ;;  %v181_v29 = vld [vmem:[#allocation7 + $0x50] sm:$0xff]  ;;  %v184_v30 = vld [vmem:[#allocation7 + $0x68] sm:$0xff]  ;;  %v186_v31 = vld [vmem:[#allocation7 + $0x78] sm:$0xff]  ;;  %v491_v32 = vpack.c.bf16 %v88_v26, %v87_v24 }
  0x52   :  { %486 = vmatpush3.bf16.msra.mxu0 %v485_v9  ;;  %498 = vmatprep.subr.bf16.mxu1 %v497_v18  ;;  %v503_v33 = vpack.c.bf16 %v181_v29, %v179_v28  ;;  %v505_v34 = vpack.c.bf16 %v186_v31, %v184_v30  ;;  %v183_v35 = vld [vmem:[#allocation7 + $0x60] sm:$0xff]  ;;  %v185_v36 = vld [vmem:[#allocation7 + $0x70] sm:$0xff]  ;;  %v188_v37 = vld [vmem:[#allocation7 + $0x88] sm:$0xff] }
  0x53   :  { %487 = vmatprep.subr.bf16.mxu0 %v695_v0  ;;  %v190_v38 = vld [vmem:[#allocation7 + $0x98] sm:$0xff]  ;;  %v507_v40 = vpack.c.bf16 %v185_v36, %v183_v35  ;;  %v187_v42 = vld [vmem:[#allocation7 + $0x80] sm:$0xff]  ;;  %v189_v43 = vld [vmem:[#allocation7 + $0x90] sm:$0xff] }
  0x54   :  { %v80_v39 = vld [vmem:[#allocation2] sm:$0xff]  ;;  %v509_v41 = vpack.c.bf16 %v190_v38, %v188_v37  ;;  %v192_v44 = vld [vmem:[#allocation7 + $0xa8] sm:$0xff]  ;;  %v511_v46 = vpack.c.bf16 %v189_v43, %v187_v42  ;;  %v191_v48 = vld [vmem:[#allocation7 + $0xa0] sm:$0xff] }
  0x55   :  { %500 = vmatpush1.bf16.msra.mxu1 %v499_v25  ;;  %v194_v45 = vld [vmem:[#allocation7 + $0xb8] sm:$0xff]  ;;  %v193_v49 = vld [vmem:[#allocation7 + $0xb0] sm:$0xff]  ;;  %v196_v50 = vld [vmem:[#allocation7 + $0xc8] sm:$0xff] }
  0x56   :  { %489 = vmatpush3.bf16.msra.mxu0 %v488_v23  ;;  %502 = vmatprep.subr.bf16.mxu1 %v501_v27  ;;  %v513_v47 = vpack.c.bf16 %v194_v45, %v192_v44  ;;  %v198_v51 = vld [vmem:[#allocation7 + $0xd8] sm:$0xff]  ;;  %v515_v52 = vpack.c.bf16 %v193_v49, %v191_v48  ;;  %v195_v54 = vld [vmem:[#allocation7 + $0xc0] sm:$0xff]  ;;  %v197_v55 = vld [vmem:[#allocation7 + $0xd0] sm:$0xff] }
  0x57   :  { %490 = vmatprep.subr.bf16.mxu0 %v695_v0  ;;  %v517_v53 = vpack.c.bf16 %v198_v51, %v196_v50  ;;  %v519_v56 = vpack.c.bf16 %v197_v55, %v195_v54  ;;  %v200_v57 = vld [vmem:[#allocation7 + $0xe8] sm:$0xff]  ;;  %v202_v58 = vld [vmem:[#allocation7 + $0xf8] sm:$0xff]  ;;  %v199_v60 = vld [vmem:[#allocation7 + $0xe0] sm:$0xff] }
  0x58   :  { %v521_v59 = vpack.c.bf16 %v202_v58, %v200_v57  ;;  %v201_v61 = vld [vmem:[#allocation7 + $0xf0] sm:$0xff]  ;;  %v304_v63 = vld [vmem:[#allocation8 + $0x80] sm:$0xff]  ;;  %v305_v0 = vld [vmem:[#allocation8 + $0x88] sm:$0xff] }
  0x59   :  { %504 = vmatpush1.bf16.msra.mxu1 %v503_v33  ;;  %v523_v62 = vpack.c.bf16 %v201_v61, %v199_v60  ;;  %v288_v1 = vld [vmem:[#allocation8] sm:$0xff]  ;;  %v525_v2 = vpack.c.bf16 %v305_v0, %v304_v63  ;;  %v289_v3 = vld [vmem:[#allocation8 + $0x8] sm:$0xff]  ;;  %v306_v4 = vld [vmem:[#allocation8 + $0x90] sm:$0xff] }
  0x5a   :  { %492 = vmatpush3.bf16.msra.mxu0 %v491_v32  ;;  %506 = vmatprep.subr.bf16.mxu1 %v505_v34  ;;  %v307_v5 = vld [vmem:[#allocation8 + $0x98] sm:$0xff]  ;;  %v527_v6 = vpack.c.bf16 %v289_v3, %v288_v1  ;;  %v290_v8 = vld [vmem:[#allocation8 + $0x10] sm:$0xff]  ;;  %v308_v10 = vld [vmem:[#allocation8 + $0xa0] sm:$0xff] }
  0x5b   :  { %v529_v7 = vpack.c.bf16 %v307_v5, %v306_v4  ;;  %v291_v9 = vld [vmem:[#allocation8 + $0x18] sm:$0xff]  ;;  %526 = vmatprep.subr.bf16.mxu0 %v525_v2  ;;  %v309_v11 = vld [vmem:[#allocation8 + $0xa8] sm:$0xff]  ;;  %v292_v14 = vld [vmem:[#allocation8 + $0x20] sm:$0xff] }
  0x5c   :  { %v531_v12 = vpack.c.bf16 %v291_v9, %v290_v8  ;;  %v533_v13 = vpack.c.bf16 %v309_v11, %v308_v10  ;;  %v293_v15 = vld [vmem:[#allocation8 + $0x28] sm:$0xff]  ;;  %v310_v16 = vld [vmem:[#allocation8 + $0xb0] sm:$0xff]  ;;  %v311_v17 = vld [vmem:[#allocation8 + $0xb8] sm:$0xff] }
  0x5d   :  { %479 = vmatmul.mubr.msk.f32.vlgmr.msra.gmra.mrb[0].mxu0 %vm96_vm1, %v80_v39  ;;  %508 = vmatpush1.bf16.msra.mxu1 %v507_v40  ;;  %v535_v18 = vpack.c.bf16 %v293_v15, %v292_v14  ;;  %v537_v19 = vpack.c.bf16 %v311_v17, %v310_v16  ;;  %v294_v20 = vld [vmem:[#allocation8 + $0x30] sm:$0xff]  ;;  %v295_v21 = vld [vmem:[#allocation8 + $0x38] sm:$0xff]  ;;  %v312_v22 = vld [vmem:[#allocation8 + $0xc0] sm:$0xff] }
  0x5e   :  { %510 = vmatprep.subr.bf16.mxu1 %v509_v41  ;;  %528 = vmatpush3.bf16.msra.mxu0 %v527_v6  ;;  %v313_v23 = vld [vmem:[#allocation8 + $0xc8] sm:$0xff]  ;;  %v539_v24 = vpack.c.bf16 %v295_v21, %v294_v20  ;;  %v296_v26 = vld [vmem:[#allocation8 + $0x40] sm:$0xff]  ;;  %v314_v28 = vld [vmem:[#allocation8 + $0xd0] sm:$0xff] }
  0x5f   :  { %530 = vmatprep.subr.bf16.mxu0 %v529_v7  ;;  %v541_v25 = vpack.c.bf16 %v313_v23, %v312_v22  ;;  %v297_v27 = vld [vmem:[#allocation8 + $0x48] sm:$0xff]  ;;  %v315_v29 = vld [vmem:[#allocation8 + $0xd8] sm:$0xff]  ;;  %v298_v32 = vld [vmem:[#allocation8 + $0x50] sm:$0xff] }
  0x60   :  { %v543_v30 = vpack.c.bf16 %v297_v27, %v296_v26  ;;  %v545_v31 = vpack.c.bf16 %v315_v29, %v314_v28  ;;  %v299_v33 = vld [vmem:[#allocation8 + $0x58] sm:$0xff]  ;;  %v316_v34 = vld [vmem:[#allocation8 + $0xe0] sm:$0xff]  ;;  %v317_v35 = vld [vmem:[#allocation8 + $0xe8] sm:$0xff] }
  0x61   :  { %512 = vmatpush1.bf16.msra.mxu1 %v511_v46  ;;  %v547_v36 = vpack.c.bf16 %v299_v33, %v298_v32  ;;  %v549_v37 = vpack.c.bf16 %v317_v35, %v316_v34  ;;  %v415_v38 = vld [vmem:[%s816_s2] ss:$0 sm:$0xff]  ;;  %v300_v43 = vld [vmem:[#allocation8 + $0x60] sm:$0xff]  ;;  %v301_v44 = vld [vmem:[#allocation8 + $0x68] sm:$0xff] }
  0x62   :  { %514 = vmatprep.subr.bf16.mxu1 %v513_v47  ;;  %532 = vmatpush3.bf16.msra.mxu0 %v531_v12  ;;  %v551_v45 = vpack.c.bf16 %v301_v44, %v300_v43  ;;  %v318_v46 = vld [vmem:[#allocation8 + $0xf0] sm:$0xff]  ;;  %v319_v47 = vld [vmem:[#allocation8 + $0xf8] sm:$0xff] }
  0x63   :  { %534 = vmatprep.subr.bf16.mxu0 %v533_v13  ;;  %v553_v48 = vpack.c.bf16 %v319_v47, %v318_v46  ;;  %v302_v49 = vld [vmem:[#allocation8 + $0x70] sm:$0xff]  ;;  %v303_v50 = vld [vmem:[#allocation8 + $0x78] sm:$0xff] }
  0x64   :  { %v555_v51 = vpack.c.bf16 %v303_v50, %v302_v49  ;;  %v203_v55 = vld [vmem:[%s818_s4] sm:$0x3]  ;;  %s657_s4 = scalar_lea.vmem %s405_s8, 128 }
  0x65   :  { %516 = vmatpush1.bf16.msra.mxu1 %v515_v52  ;;  %v205_v52 = vlaneseq  ;;  %v417_v2 = vld [vmem:[%s820_s6] ss:$0 sm:$0xff]  ;;  %p658_p4 = scmp.ne.s32.totalorder %s405_s8, %s657_s4  ;;  %p663_p6 = scmp.lt.s32.totalorder %s657_s4, %s657_s4 }
  0x66   :  { %518 = vmatprep.subr.bf16.mxu1 %v517_v53  ;;  %536 = vmatpush3.bf16.msra.mxu0 %v535_v18 }
  0x67   :  { %538 = vmatprep.subr.bf16.mxu0 %v537_v19  ;;  %v206_v53 = vshrl.u32 %v205_v52, 7  ;;  %p664_p7 = por %p663_p6, %p662_p5 }
  0x69   :  { %520 = vmatpush1.bf16.msra.mxu1 %v519_v56  ;;  %v207_v54 = vsub.s32 0, %v206_v53  ;;  %v211_v56 = vsub.s32 1, %v206_v53  ;;  %p665_p8 = pnand %p664_p7, %p658_p4 }
  0x6a   :  { %522 = vmatprep.subr.bf16.mxu1 %v521_v59  ;;  %540 = vmatpush3.bf16.msra.mxu0 %v539_v24 }
  0x6b   :  { %542 = vmatprep.subr.bf16.mxu0 %v541_v25  ;;  %v208_v57 = vrot.slane %v203_v55, %v207_v54  ;;  %v212_v58 = vrot.slane %v203_v55, %v211_v56 }
  0x6d   :  { %524 = vmatpush1.bf16.msra.mxu1 %v523_v62 }
  0x6e   :  { %544 = vmatpush3.bf16.msra.mxu0 %v543_v30 }
  0x6f   :  { %546 = vmatprep.subr.bf16.mxu0 %v545_v31 }
  0x72   :  { %548 = vmatpush3.bf16.msra.mxu0 %v547_v36 }
  0x73   :  { %550 = vmatprep.subr.bf16.mxu0 %v549_v37 }
  0x76   :  { %552 = vmatpush3.bf16.msra.mxu0 %v551_v45 }
  0x77   :  { %554 = vmatprep.subr.bf16.mxu0 %v553_v48 }
  0x7a   :  { %556 = vmatpush3.bf16.msra.mxu0 %v555_v51 }
 0x130   :  { %v166_v39 = vpop.f32.mrb[0].mxu0 }
 0x131   :  { %v167_v40 = vadd.f32 %v415_v38, %v166_v39  ;;  %v480_v41 = vpop.f32.mrb[1].mxu0 }
 0x133   :  { %v170_v42 = vmax.f32 %v167_v40, 0.0 }
 0x135   :  { %280 = vmatmul.mubr.f32.vlgmr.msra.gmra.mrb[0].mxu1 %v170_v42 }
 0x208   :  { %v281_v59 = vpop.f32.mrb[0].mxu1 }
 0x209   :  { %v282_v60 = vadd.f32 %v281_v59, %v208_v57  ;;  %v283_v61 = vpop.f32.mrb[1].mxu1 }
 0x20a   :  { %v284_v62 = vadd.f32 %v283_v61, %v212_v58 }
 0x20b   :  { %v286_v0 = vmax.f32 %v282_v60, 0.0 }
 0x20c   :  { %v287_v63 = vmax.f32 %v284_v62, 0.0 }
 0x20e   :  { %391 = vmatprep.mubr.f32.mxu0 %v287_v63 }
 0x20f   :  { %392 = vmatmul.mubr.f32.vlgmr.msra.gmra.mrb[2].mxu0 %v286_v0 }
 0x2e2   :  { %v459_v1 = vpop.f32.mrb[2].mxu0 }
 0x2e3   :  { %v460_v3 = vpop.f32.mrb[3].mxu0 }
 0x2e4   :  { %v461_v4 = vadd.f32 %v460_v3, %v459_v1 }
 0x2e6   :  { %v394_v5 = vadd.f32 %v461_v4, %v417_v2 }
 0x2e8   :  { %397 = vst [vmem:[#allocation10] sm:$0xff] %v394_v5 }
 0x2e9   :  { %668 = shalt.err (!%p665_p8)
}
 0x2ea   :  { %s669_s13 = scalar_lea.hbm %s821_s7, 128 }
 0x2eb   :  { %p670_p9 = scmp.ne.s32.totalorder %s821_s7, %s669_s13  ;;  %p673_p10 = scmp.lt.u32.totalorder %s669_s13, %s821_s7 }
 0x2ed   :  { %p675_p11 = pnand %p673_p10, %p670_p9 }
 0x2ef   :  { %678 = shalt.err (!%p675_p11)
}
 0x2f0   :  { %407 = dma.vmem_to_hbm [thread:$0]  %s405_s8, 128, %s821_s7, [#allocation4]  }
 0x2f1   :  { %685 = dma.done.wait [#allocation4], 128  }
 0x2f2   :  { %686 = vsyncadd [#allocation4], 4294967168 }
 0x2f3   :  { %411 = vsyncpa [#allocation3], 1 }
 0x2f4   :  { %412 = vsyncpa [#allocation6], 1 }
 0x2f5   :  { %413 = vsyncpa [#allocation9], 1 }
 0x2f6   :  { %414 = vsyncpa [#allocation4], 1 }

</bundles_post_ra>
